<compile_context>
chip_gen: v7x
topology: tpu7x:2x2x1
jax: 0.10.0
libtpu: 0.0.40
codegen_flags: <defaults>
</compile_context>

<pallas_src>
import jax
import jax.numpy as jnp
from jax import lax
from jax.experimental import pallas as pl
from jax.experimental.pallas import tpu as pltpu

BN_EPS = 1e-5
LANE = 128


def _round_up(x, m):
    return (x + m - 1) // m * m


def _make_conv_stats_kernel(K, HWo, Cpad):
    """Pass-1 kernel: K packed-tap matmuls (bf16 MXU / f32 acc) + bias + per-n BN partials."""

    def kernel(*refs):
        plane_refs = refs[:K]                       # K refs, each (HWo, K*K*Cin) bf16
        w_ref, b_ref, conv_ref, stats_ref = refs[K:]

        # Zero this batch-index's partial-stats accumulator at its first depth step.
        @pl.when(pl.program_id(1) == 0)
        def _init():
            stats_ref[...] = jnp.zeros_like(stats_ref)

        # Conv3d: one matmul per depth tap, (kh, kw, ci) packed in the contraction dim.
        acc = jnp.broadcast_to(b_ref[...], (HWo, Cpad))             # f32, bias folded in
        for kd in range(K):
            acc = acc + jnp.dot(plane_refs[kd][...], w_ref[kd],
                                preferred_element_type=jnp.float32)
        conv_ref[...] = acc.astype(conv_ref.dtype)                  # bf16 intermediate

        # Per-channel sum / sum-of-squares from the f32 accumulator (no junk columns, no mask).
        stats_ref[0:1, :] += jnp.sum(acc, axis=0, keepdims=True)
        stats_ref[1:2, :] += jnp.sum(acc * acc, axis=0, keepdims=True)

    return kernel


def _bn_relu_kernel(y_ref, scale_ref, shift_ref, o_ref):
    """Pass-2 kernel: y = relu(conv * scale + shift), fused per-channel scale/shift."""
    y = y_ref[...].astype(jnp.float32)
    o_ref[...] = jnp.maximum(y * scale_ref[...] + shift_ref[...], 0.0)


def conv3d_block_forward(x_ncdhw, weight, bias, gamma, beta, kernel_size=3):
    """Conv3d(k, stride=1, padding=(k-1)//2) + BatchNorm3d(train) + ReLU.  x: (N,Cin,D,H,W)."""
    K = kernel_size
    assert K % 2 == 1, "only odd kernel sizes supported (Conv3DBlock default is 3)"
    p = (K - 1) // 2
    N, Cin, D, H, W = x_ncdhw.shape
    Cout = weight.shape[0]

    Cpad = _round_up(Cout, LANE)        # lane-dense output channels
    Dp = D + 2 * p
    HWo = H * W                         # exact output-plane rows (no width junk)
    KKC = K * K * Cin                   # packed contraction depth

    # ---- glue: NCDHW -> padded NDHWC bf16, pack (kh, kw) taps into the contraction dim ----
    x = jnp.transpose(x_ncdhw, (0, 2, 3, 4, 1)).astype(jnp.bfloat16)   # (N, D, H, W, Cin)
    xp = jnp.pad(x, ((0, 0), (p, p), (p, p), (p, p), (0, 0)))          # (N, Dp, Hp, Wp, Cin)
    cols = [xp[:, :, kh:kh + H, kw:kw + W, :] for kh in range(K) for kw in range(K)]
    xcol = jnp.concatenate(cols, axis=-1).reshape(N, Dp, HWo, KKC)     # (N, Dp, H*W, K*K*Cin)

    # weight (Cout, Cin, kd, kh, kw) -> (K, K*K*Cin, Cpad) bf16, matching (kh, kw, ci) packing
    w_packed = jnp.transpose(weight, (2, 3, 4, 1, 0)).reshape(K, KKC, Cout)
    w_packed = jnp.pad(w_packed, ((0, 0), (0, 0), (0, Cpad - Cout))).astype(jnp.bfloat16)
    b_pad = jnp.pad(bias.astype(jnp.float32), (0, Cpad - Cout)).reshape(1, Cpad)

    # ---- pass 1: conv + bias + per-n BN partial statistics ----
    # TODO(synk): replace the K shifted-plane inputs with one rolling-buffer manual DMA when
    #             Cin is large enough for the Kx depth-plane re-read to matter.
    plane_specs = [
        pl.BlockSpec((None, None, HWo, KKC), lambda n, d, kd=kd: (n, d + kd, 0, 0))
        for kd in range(K)
    ]
    conv_out, stats = pl.pallas_call(
        _make_conv_stats_kernel(K, HWo, Cpad),
        grid=(N, D),
        in_specs=plane_specs + [
            pl.BlockSpec((K, KKC, Cpad), lambda n, d: (0, 0, 0)),       # resident weights
            pl.BlockSpec((1, Cpad), lambda n, d: (0, 0)),               # resident bias
        ],
        out_specs=(
            pl.BlockSpec((None, None, HWo, Cpad), lambda n, d: (n, d, 0, 0)),
            pl.BlockSpec((None, 2, Cpad), lambda n, d: (n, 0, 0)),      # per-n partial stats
        ),
        out_shape=(
            jax.ShapeDtypeStruct((N, D, HWo, Cpad), jnp.bfloat16),      # bf16 conv intermediate
            jax.ShapeDtypeStruct((N, 2, Cpad), jnp.float32),
        ),
        compiler_params=pltpu.CompilerParams(
            # N axis is safe to parallelize (per-n stats); D is the stats-revisit axis.
            # Default scoped-VMEM budget is ample for these tiles on v5e/v6e/v7x.
            dimension_semantics=("parallel", "arbitrary"),
        ),
    )(*([xcol] * K), w_packed, b_pad)

    # ---- glue: O(Cout) BN finalize (batch mean / biased variance, eps=1e-5) ----
    # TODO(synk): switch to Welford-style accumulation if E[x^2]-E[x]^2 cancellation ever bites.
    stats_sum = jnp.sum(stats, axis=0)                                  # (2, Cpad)
    count = jnp.float32(N * D * H * W)
    mean = stats_sum[0] / count
    var = jnp.maximum(stats_sum[1] / count - mean * mean, 0.0)
    inv = lax.rsqrt(var + BN_EPS)
    gamma_pad = jnp.pad(gamma.astype(jnp.float32), (0, Cpad - Cout))
    beta_pad = jnp.pad(beta.astype(jnp.float32), (0, Cpad - Cout))
    scale_v = gamma_pad * inv
    shift_v = beta_pad - mean * scale_v
    scale = scale_v.reshape(1, Cpad)
    shift = shift_v.reshape(1, Cpad)

    # ---- pass 2: normalize + ReLU over large lane-dense row blocks ----
    rows_total = N * D * HWo
    rows_blk = rows_total
    for cand in (2048, 1024, 512, 256, 128, 64, 32, 16):
        if rows_total % cand == 0:
            rows_blk = cand
            break
    y = pl.pallas_call(
        _bn_relu_kernel,
        grid=(rows_total // rows_blk,),
        in_specs=[
            pl.BlockSpec((rows_blk, Cpad), lambda i: (i, 0)),
            pl.BlockSpec((1, Cpad), lambda i: (0, 0)),
            pl.BlockSpec((1, Cpad), lambda i: (0, 0)),
        ],
        out_specs=pl.BlockSpec((rows_blk, Cpad), lambda i: (i, 0)),
        out_shape=jax.ShapeDtypeStruct((rows_total, Cpad), jnp.float32),
        compiler_params=pltpu.CompilerParams(dimension_semantics=("parallel",)),
    )(conv_out.reshape(rows_total, Cpad), scale, shift)

    # ---- glue: strip channel padding, back to NCDHW ----
    # TODO(synk): return NDHWC directly if the downstream consumer accepts channel-last.
    y = y.reshape(N, D, H, W, Cpad)[..., :Cout]
    return jnp.transpose(y, (0, 4, 1, 2, 3))


def reference_forward(x, weight, bias, gamma, beta):
    """Pure-JAX reference: Conv3d (bf16 inputs / f32 acc) + BatchNorm3d(train) + ReLU."""
    y = lax.conv_general_dilated(
        x.astype(jnp.bfloat16), weight.astype(jnp.bfloat16),
        window_strides=(1, 1, 1), padding=[(1, 1)] * 3,
        dimension_numbers=('NCDHW', 'OIDHW', 'NCDHW'),
        preferred_element_type=jnp.float32)
    y = y + bias.reshape(1, -1, 1, 1, 1)
    mean = jnp.mean(y, axis=(0, 2, 3, 4), keepdims=True)
    var = jnp.mean((y - mean) ** 2, axis=(0, 2, 3, 4), keepdims=True)
    y = (y - mean) * lax.rsqrt(var + BN_EPS)
    y = y * gamma.reshape(1, -1, 1, 1, 1) + beta.reshape(1, -1, 1, 1, 1)
    return jnp.maximum(y, 0.0)


if __name__ == "__main__":
    # Small shapes: N=2, Cin=4, Cout=8, D=H=W=8, kernel=3
    N, Cin, Cout, D, H, W, K = 2, 4, 8, 8, 8, 8, 3

    key = jax.random.PRNGKey(0)
    kx, kw, kb = jax.random.split(key, 3)

    x = jax.random.normal(kx, (N, Cin, D, H, W), dtype=jnp.float32)

    # Deterministic parameter init mirroring PyTorch defaults:
    # Conv3d: uniform(-1/sqrt(fan_in), 1/sqrt(fan_in)); BatchNorm3d: gamma=1, beta=0.
    fan_in = Cin * K * K * K
    bound = 1.0 / jnp.sqrt(jnp.asarray(fan_in, jnp.float32))
    weight = jax.random.uniform(kw, (Cout, Cin, K, K, K),
                                minval=-bound, maxval=bound, dtype=jnp.float32)
    bias = jax.random.uniform(kb, (Cout,), minval=-bound, maxval=bound,
                              dtype=jnp.float32)
    gamma = jnp.ones((Cout,), jnp.float32)
    beta = jnp.zeros((Cout,), jnp.float32)

    out = conv3d_block_forward(x, weight, bias, gamma, beta, kernel_size=K)
    out = jax.block_until_ready(out)

    ref = jax.block_until_ready(reference_forward(x, weight, bias, gamma, beta))

    assert out.shape == (N, Cout, D, H, W), out.shape
    # Tolerance accounts for the bf16 conv intermediate (review-requested HBM saving);
    # bf16 rounding of a ~N(0,1) normalized value bounds the error at ~8e-3.
    assert jnp.allclose(out, ref, atol=2e-2, rtol=2e-2), \
        f"max abs err = {jnp.max(jnp.abs(out - ref))}"

    print("KERNEL_OK")
</pallas_src>

<mosaic_0001>
module attributes {stable_mosaic.version = 11 : i64} {
  func.func @kernel(%arg0: i32, %arg1: i32, %arg2: memref<1x1x64x36xbf16, #tpu.memory_space<vmem>>, %arg3: memref<1x1x64x36xbf16, #tpu.memory_space<vmem>>, %arg4: memref<1x1x64x36xbf16, #tpu.memory_space<vmem>>, %arg5: memref<3x36x128xbf16, #tpu.memory_space<vmem>>, %arg6: memref<1x128xf32, #tpu.memory_space<vmem>>, %arg7: memref<1x1x64x128xbf16, #tpu.memory_space<vmem>>, %arg8: memref<1x2x128xf32, #tpu.memory_space<vmem>>) attributes {dimension_semantics = [#tpu.dimension_semantics<parallel>, #tpu.dimension_semantics<arbitrary>], iteration_bounds = array<i64: 2, 8>, scalar_prefetch = 0 : i64, scratch_operands = 0 : i64, tpu.core_type = #tpu.core_type<tc>, window_params = [{transform_indices = @transform_0, window_bounds = array<i64: 1, 1, 64, 36>}, {transform_indices = @transform_1, window_bounds = array<i64: 1, 1, 64, 36>}, {transform_indices = @transform_2, window_bounds = array<i64: 1, 1, 64, 36>}, {pipeline_mode = #tpu.pipeline_mode<synchronous>, transform_indices = @transform_3, window_bounds = array<i64: 3, 36, 128>}, {pipeline_mode = #tpu.pipeline_mode<synchronous>, transform_indices = @transform_4, window_bounds = array<i64: 1, 128>}, {transform_indices = @transform_5, window_bounds = array<i64: 1, 1, 64, 128>}, {transform_indices = @transform_6, window_bounds = array<i64: 1, 2, 128>}]} {
    %c0_i32 = arith.constant 0 : i32
    %0 = arith.cmpi eq, %arg1, %c0_i32 : i32
    %1 = arith.extui %0 : i1 to i32
    %c0_i32_0 = arith.constant 0 : i32
    %2 = arith.cmpi ne, %1, %c0_i32_0 : i32
    scf.if %2 {
      %cst_41 = arith.constant 0.000000e+00 : f32
      %45 = vector.broadcast %cst_41 : f32 to vector<2x128xf32>
      %c0_42 = arith.constant 0 : index
      %c0_43 = arith.constant 0 : index
      %c0_44 = arith.constant 0 : index
      %46 = vector.load %arg8[%c0_42, %c0_43, %c0_44] : memref<1x2x128xf32, #tpu.memory_space<vmem>>, vector<1x2x128xf32>
      %47 = vector.shape_cast %46 : vector<1x2x128xf32> to vector<2x128xf32>
      %48 = vector.shape_cast %45 : vector<2x128xf32> to vector<1x2x128xf32>
      tpu.vector_store %arg8[%c0_42, %c0_43, %c0_44], %48 {strides = array<i32>} : memref<1x2x128xf32, #tpu.memory_space<vmem>>, vector<1x2x128xf32>,
    } else {
    }
    %c0 = arith.constant 0 : index
    %c0_1 = arith.constant 0 : index
    %3 = vector.load %arg6[%c0, %c0_1] : memref<1x128xf32, #tpu.memory_space<vmem>>, vector<1x128xf32>
    %4 = vector.shape_cast %3 : vector<1x128xf32> to vector<1x128xf32>
    %5 = vector.broadcast %4 : vector<1x128xf32> to vector<64x128xf32>
    %c0_2 = arith.constant 0 : index
    %c0_3 = arith.constant 0 : index
    %c0_4 = arith.constant 0 : index
    %c0_5 = arith.constant 0 : index
    %6 = vector.load %arg2[%c0_2, %c0_3, %c0_4, %c0_5] : memref<1x1x64x36xbf16, #tpu.memory_space<vmem>>, vector<1x1x64x36xbf16>
    %7 = vector.shape_cast %6 : vector<1x1x64x36xbf16> to vector<64x36xbf16>
    %c0_6 = arith.constant 0 : index
    %c0_7 = arith.constant 0 : index
    %c0_8 = arith.constant 0 : index
    %8 = vector.load %arg5[%c0_6, %c0_7, %c0_8] : memref<3x36x128xbf16, #tpu.memory_space<vmem>>, vector<1x36x128xbf16>
    %9 = vector.shape_cast %8 : vector<1x36x128xbf16> to vector<36x128xbf16>
    %cst = arith.constant dense<0.000000e+00> : vector<64x128xf32>
    %10 = tpu.matmul %7, %9, %cst {dimension_numbers = #tpu.dot_dimension_numbers<[1], [0], [0], [1], [0, 0, 1, 1], [], []>} : vector<64x36xbf16>, vector<36x128xbf16>, vector<64x128xf32> -> vector<64x128xf32>
    %11 = arith.addf %5, %10 : vector<64x128xf32>
    %c0_9 = arith.constant 0 : index
    %c0_10 = arith.constant 0 : index
    %c0_11 = arith.constant 0 : index
    %c0_12 = arith.constant 0 : index
    %12 = vector.load %arg3[%c0_9, %c0_10, %c0_11, %c0_12] : memref<1x1x64x36xbf16, #tpu.memory_space<vmem>>, vector<1x1x64x36xbf16>
    %13 = vector.shape_cast %12 : vector<1x1x64x36xbf16> to vector<64x36xbf16>
    %c1 = arith.constant 1 : index
    %c0_13 = arith.constant 0 : index
    %c0_14 = arith.constant 0 : index
    %14 = vector.load %arg5[%c1, %c0_13, %c0_14] : memref<3x36x128xbf16, #tpu.memory_space<vmem>>, vector<1x36x128xbf16>
    %15 = vector.shape_cast %14 : vector<1x36x128xbf16> to vector<36x128xbf16>
    %cst_15 = arith.constant dense<0.000000e+00> : vector<64x128xf32>
    %16 = tpu.matmul %13, %15, %cst_15 {dimension_numbers = #tpu.dot_dimension_numbers<[1], [0], [0], [1], [0, 0, 1, 1], [], []>} : vector<64x36xbf16>, vector<36x128xbf16>, vector<64x128xf32> -> vector<64x128xf32>
    %17 = arith.addf %11, %16 : vector<64x128xf32>
    %c0_16 = arith.constant 0 : index
    %c0_17 = arith.constant 0 : index
    %c0_18 = arith.constant 0 : index
    %c0_19 = arith.constant 0 : index
    %18 = vector.load %arg4[%c0_16, %c0_17, %c0_18, %c0_19] : memref<1x1x64x36xbf16, #tpu.memory_space<vmem>>, vector<1x1x64x36xbf16>
    %19 = vector.shape_cast %18 : vector<1x1x64x36xbf16> to vector<64x36xbf16>
    %c2 = arith.constant 2 : index
    %c0_20 = arith.constant 0 : index
    %c0_21 = arith.constant 0 : index
    %20 = vector.load %arg5[%c2, %c0_20, %c0_21] : memref<3x36x128xbf16, #tpu.memory_space<vmem>>, vector<1x36x128xbf16>
    %21 = vector.shape_cast %20 : vector<1x36x128xbf16> to vector<36x128xbf16>
    %cst_22 = arith.constant dense<0.000000e+00> : vector<64x128xf32>
    %22 = tpu.matmul %19, %21, %cst_22 {dimension_numbers = #tpu.dot_dimension_numbers<[1], [0], [0], [1], [0, 0, 1, 1], [], []>} : vector<64x36xbf16>, vector<36x128xbf16>, vector<64x128xf32> -> vector<64x128xf32>
    %23 = arith.addf %17, %22 : vector<64x128xf32>
    %24 = arith.truncf %23 : vector<64x128xf32> to vector<64x128xbf16>
    %c0_23 = arith.constant 0 : index
    %c0_24 = arith.constant 0 : index
    %c0_25 = arith.constant 0 : index
    %c0_26 = arith.constant 0 : index
    %25 = vector.load %arg7[%c0_23, %c0_24, %c0_25, %c0_26] : memref<1x1x64x128xbf16, #tpu.memory_space<vmem>>, vector<1x1x64x128xbf16>
    %26 = vector.shape_cast %25 : vector<1x1x64x128xbf16> to vector<64x128xbf16>
    %27 = vector.shape_cast %24 : vector<64x128xbf16> to vector<1x1x64x128xbf16>
    tpu.vector_store %arg7[%c0_23, %c0_24, %c0_25, %c0_26], %27 {strides = array<i32>} : memref<1x1x64x128xbf16, #tpu.memory_space<vmem>>, vector<1x1x64x128xbf16>,
    %c0_27 = arith.constant 0 : index
    %c0_28 = arith.constant 0 : index
    %c0_29 = arith.constant 0 : index
    %28 = vector.load %arg8[%c0_27, %c0_28, %c0_29] : memref<1x2x128xf32, #tpu.memory_space<vmem>>, vector<1x1x128xf32>
    %29 = vector.shape_cast %28 : vector<1x1x128xf32> to vector<1x128xf32>
    %cst_30 = arith.constant dense<0.000000e+00> : vector<128xf32>
    %30 = vector.multi_reduction <add>, %23, %cst_30 [0] : vector<64x128xf32> to vector<128xf32>
    %31 = vector.shape_cast %30 : vector<128xf32> to vector<1x128xf32>
    %32 = arith.addf %29, %31 : vector<1x128xf32>
    %c0_31 = arith.constant 0 : index
    %c0_32 = arith.constant 0 : index
    %c0_33 = arith.constant 0 : index
    %33 = vector.load %arg8[%c0_31, %c0_32, %c0_33] : memref<1x2x128xf32, #tpu.memory_space<vmem>>, vector<1x1x128xf32>
    %34 = vector.shape_cast %33 : vector<1x1x128xf32> to vector<1x128xf32>
    %35 = vector.shape_cast %32 : vector<1x128xf32> to vector<1x1x128xf32>
    tpu.vector_store %arg8[%c0_31, %c0_32, %c0_33], %35 {strides = array<i32>} : memref<1x2x128xf32, #tpu.memory_space<vmem>>, vector<1x1x128xf32>,
    %c0_34 = arith.constant 0 : index
    %c1_35 = arith.constant 1 : index
    %c0_36 = arith.constant 0 : index
    %36 = vector.load %arg8[%c0_34, %c1_35, %c0_36] : memref<1x2x128xf32, #tpu.memory_space<vmem>>, vector<1x1x128xf32>
    %37 = vector.shape_cast %36 : vector<1x1x128xf32> to vector<1x128xf32>
    %38 = arith.mulf %23, %23 : vector<64x128xf32>
    %cst_37 = arith.constant dense<0.000000e+00> : vector<128xf32>
    %39 = vector.multi_reduction <add>, %38, %cst_37 [0] : vector<64x128xf32> to vector<128xf32>
    %40 = vector.shape_cast %39 : vector<128xf32> to vector<1x128xf32>
    %41 = arith.addf %37, %40 : vector<1x128xf32>
    %c0_38 = arith.constant 0 : index
    %c1_39 = arith.constant 1 : index
    %c0_40 = arith.constant 0 : index
    %42 = vector.load %arg8[%c0_38, %c1_39, %c0_40] : memref<1x2x128xf32, #tpu.memory_space<vmem>>, vector<1x1x128xf32>
    %43 = vector.shape_cast %42 : vector<1x1x128xf32> to vector<1x128xf32>
    %44 = vector.shape_cast %41 : vector<1x128xf32> to vector<1x1x128xf32>
    tpu.vector_store %arg8[%c0_38, %c1_39, %c0_40], %44 {strides = array<i32>} : memref<1x2x128xf32, #tpu.memory_space<vmem>>, vector<1x1x128xf32>,
    return
  }
  func.func @transform_0(%arg0: i32, %arg1: i32) -> (i32, i32, i32, i32) {
    %c0_i32 = arith.constant 0 : i32
    %0 = arith.addi %arg1, %c0_i32 : i32
    %c0_i32_0 = arith.constant 0 : i32
    %c0_i32_1 = arith.constant 0 : i32
    %c0_i32_2 = arith.constant 0 : i32
    return %arg0, %0, %c0_i32_0, %c0_i32_1 : i32, i32, i32, i32
  }
  func.func @transform_1(%arg0: i32, %arg1: i32) -> (i32, i32, i32, i32) {
    %c1_i32 = arith.constant 1 : i32
    %0 = arith.addi %arg1, %c1_i32 : i32
    %c0_i32 = arith.constant 0 : i32
    %c0_i32_0 = arith.constant 0 : i32
    %c0_i32_1 = arith.constant 0 : i32
    return %arg0, %0, %c0_i32, %c0_i32_0 : i32, i32, i32, i32
  }
  func.func @transform_2(%arg0: i32, %arg1: i32) -> (i32, i32, i32, i32) {
    %c2_i32 = arith.constant 2 : i32
    %0 = arith.addi %arg1, %c2_i32 : i32
    %c0_i32 = arith.constant 0 : i32
    %c0_i32_0 = arith.constant 0 : i32
    %c0_i32_1 = arith.constant 0 : i32
    return %arg0, %0, %c0_i32, %c0_i32_0 : i32, i32, i32, i32
  }
  func.func @transform_3(%arg0: i32, %arg1: i32) -> (i32, i32, i32) {
    %c0_i32 = arith.constant 0 : i32
    %c0_i32_0 = arith.constant 0 : i32
    %c0_i32_1 = arith.constant 0 : i32
    %c0_i32_2 = arith.constant 0 : i32
    return %c0_i32, %c0_i32_0, %c0_i32_1 : i32, i32, i32
  }
  func.func @transform_4(%arg0: i32, %arg1: i32) -> (i32, i32) {
    %c0_i32 = arith.constant 0 : i32
    %c0_i32_0 = arith.constant 0 : i32
    %c0_i32_1 = arith.constant 0 : i32
    return %c0_i32, %c0_i32_0 : i32, i32
  }
  func.func @transform_5(%arg0: i32, %arg1: i32) -> (i32, i32, i32, i32) {
    %c0_i32 = arith.constant 0 : i32
    %c0_i32_0 = arith.constant 0 : i32
    %c0_i32_1 = arith.constant 0 : i32
    return %arg0, %arg1, %c0_i32, %c0_i32_0 : i32, i32, i32, i32
  }
  func.func @transform_6(%arg0: i32, %arg1: i32) -> (i32, i32, i32) {
    %c0_i32 = arith.constant 0 : i32
    %c0_i32_0 = arith.constant 0 : i32
    %c0_i32_1 = arith.constant 0 : i32
    return %arg0, %c0_i32, %c0_i32_0 : i32, i32, i32
  }
}

</mosaic_0001>

<bundles_post_ra>
// kernel: tpu_custom_call.1
= control target key start
LH: loop header
LB: loop body
LE: loop exit
PB: predicated region body
PF: predicated region fallthrough
CT: control target
= control target key end

     0   :  { %s1928_s0 = inlined_call_operand.vmem [shape: bf16[2,10,64,36], index: 0, kind: input, shape index: {}]   ;;  %s1929_s1 = inlined_call_operand.vmem [shape: bf16[2,10,64,36], index: 1, kind: input, shape index: {}]   ;;  %s1930_s2 = inlined_call_operand.vmem [shape: bf16[2,10,64,36], index: 2, kind: input, shape index: {}]   ;;  %s1931_s3 = inlined_call_operand.vmem [shape: bf16[3,36,128], index: 3, kind: input, shape index: {}]   ;;  %s1932_s4 = inlined_call_operand.vmem [shape: f32[1,128], index: 4, kind: input, shape index: {}]   ;;  %s1933_s5 = inlined_call_operand.hbm [shape: bf16[2,8,64,128], index: 5, kind: output, shape index: {0}]   ;;  %s1934_s6 = inlined_call_operand.hbm [shape: f32[2,2,128], index: 6, kind: output, shape index: {1}]  }
   0x1   :  { %1953 = sst [smem:[#allocation23_spill]] %s1934_s6 }
   0x2   :  { %12 = vsyncpa [#allocation3], 0 }
   0x3   :  { %14 = vsyncpa [#allocation3 + $0x1], 0 }
   0x4   :  { %15 = vsyncpa [#allocation5], 0 }
   0x5   :  { %17 = vsyncpa [#allocation5 + $0x1], 0  ;;  %s1588_s21 = smov 0   ;;  %s1590_s22 = smov 0  }
   0x6   :  { %s1592_s23 = smov 0   ;;  %s1594_s24 = smov 0  }
   0x7   :  { %s1596_s25 = smov 0   ;;  %s1598_s26 = smov 0  }
   0x8   :  { %s1600_s27 = smov 0   ;;  %s1602_s28 = smov 0  }
   0x9   :  { %s1604_s29 = smov 0   ;;  %s1606_s30 = smov 0  }
   0xa   :  { %s1608_s7 = smov 0  }
   0xb LB: > { %1954 = sst [smem:[#allocation8_spill]] %s1506_s21  ;;  %s1069_s8 = sadd.s32 4294967295, %s1546_s7   ;;  %s1546_s7 = sphi %s1608_s7, %s23_s7   ;;  %s1542_s30 = sphi %s1606_s30, %s1993_s30   ;;  %s1538_s29 = sphi %s1604_s29, %s1992_s29   ;;  %s1534_s28 = sphi %s1602_s28, %s1991_s28   ;;  %s1530_s27 = sphi %s1600_s27, %s1996_s27   ;;  %s1526_s26 = sphi %s1598_s26, %s1989_s26   ;;  %s1522_s25 = sphi %s1596_s25, %s1995_s25   ;;  %s1518_s24 = sphi %s1594_s24, %s1994_s24   ;;  %s1514_s23 = sphi %s1592_s23, %s1987_s23   ;;  %s1510_s22 = sphi %s1590_s22, %s1986_s22   ;;  %s1506_s21 = sphi %s1588_s21, %s1985_s21  }
   0xc   : > { %1955 = sst [smem:[#allocation9_spill]] %s1510_s22  ;;  %s1070_s9 = sadd.s32 4294967294, %s1546_s7  }
   0xd   : > { %1956 = sst [smem:[#allocation10_spill]] %s1514_s23  ;;  %s32_s10 = sadd.s32 1, %s1538_s29 }
   0xe   : > { %1957 = sst [smem:[#allocation11_spill]] %s1518_s24  ;;  %s35_s11 = sadd.s32 1, %s1542_s30 }
   0xf   : > { %1958 = sst [smem:[#allocation12_spill]] %s1526_s26  ;;  %p33_p0 = scmp.ge.s32.totalorder %s32_s10, 8 }
  0x10   : > { %1959 = sst [smem:[#allocation13_spill]] %s1538_s29  ;;  %s174_s12 = sadd.s32 1, %s1526_s26 }
  0x11   : > { %1960 = sst [smem:[#allocation14_spill]] %s1542_s30  ;;  %p184_p1 = scmp.ne.s32.totalorder %s1526_s26, %s1522_s25 }
  0x12   : > { %1961 = sst [smem:[#allocation15_spill]] %s1546_s7  ;;  %p1650_p2 = scmp.eq.s32.totalorder %s1069_s8, 15 }
  0x13   : > { %s1998_s10 = smov (%p33_p0, %s32_s10), 0  ;;  %s2000_s11 = smov (!%p33_p0, %s35_s11), %s1542_s30 }
  0x14   : > { %1963 = sst [smem:[#allocation16_spill]] %s1998_s10  ;;  %s170_s14 = ssub.s32 %s1538_s29, %s1998_s10 }
  0x15   : > { %p1661_p3 = por %p1650_p2, %p184_p1  ;;  %p37_p4 = scmp.ge.s32.totalorder %s2000_s11, 2 }
  0x16   : > { %p190_p5 = scmp.ne.s32.totalorder %s1522_s25, %s1518_s24  ;;  %p1667_p6 = scmp.eq.s32.totalorder %s1070_s9, 15 }
  0x17   : > { %s200_s17 = sadd.s32 1, %s1514_s23  ;;  %s2002_s11 = smov (%p37_p4, %s2000_s11), 0 }
  0x18   : > { %1966 = sst [smem:[#allocation17_spill]] %s2002_s11  ;;  %p1676_p7 = por %p1667_p6, %p190_p5 }
  0x19   : > { %p210_p8 = scmp.ne.s32.totalorder %s1514_s23, %s1510_s22  ;;  %s169_s19 = ssub.s32 %s1542_s30, %s2002_s11 }
  0x1a   : > { %s1967_s18 = scalar_select %p1676_p7, 1, 0 }
  0x1b   : > { %p216_p9 = scmp.ne.s32.totalorder %s1510_s22, %s1506_s21  ;;  %s171_s20 = sor.u32 %s170_s14, %s169_s19 }
  0x1c   : > { %1968 = sst [smem:[#allocation18_spill]] %s1967_s18  ;;  %p198_p10 = scmp.eq.s32.totalorder %s169_s19, 0 }
  0x1d   : > { %p172_p11 = scmp.eq.s32.totalorder %s171_s20, 0  ;;  %p1688_p12 = por %p210_p8, %p1650_p2 }
  0x1e   : > { %s1693_s9 = scalar_select %p198_p10, %s1514_s23, %s200_s17  }
  0x1f   : > { %s1969_s8 = scalar_select %p1688_p12, 1, 0 }
  0x20   : > { %1971 = sst [smem:[#allocation20_spill]] %s1693_s9  ;;  %p1700_p13 = por %p216_p9, %p1667_p6 }
  0x21   : > { %1970 = sst [smem:[#allocation19_spill]] %s1969_s8  ;;  %p1073_p0 = scmp.ge.s32.totalorder %s1546_s7, 1 }
  0x22   : > { %s1696_s10 = scalar_select %p172_p11, %s1526_s26, %s174_s12  }
  0x23   : > { %s1973_s29 = scalar_select %p1700_p13, 1, 0 }
  0x24   : > { %1972 = sst [smem:[#allocation21_spill]] %s1696_s10  ;;  %p281_p1 = scmp.lt.s32.totalorder %s1546_s7, 17 }
  0x25   : > { %1974 = sst [smem:[#allocation22_spill]] %s1973_s29 }
  0x26   : > { %p282_p4 = pnand %p1073_p0, %p281_p1 }
  0x27   : > { %s1944_s12 = sand.u32 (!%p282_p4), 1, %s1522_s25   ;;  %s1943_s13 = sand.u32 (!%p282_p4), 1, %s1510_s22  }
  0x28   : > { %285 = sbr.rel (%p282_p4) target bundleno = 364 (0x16c), region = 40  ;;  %s1074_s14 = sshll.u32 (!%p282_p4), %s1944_s12, 5 }
  0x29   : > { %s1075_s16 = sshll.u32 (!%p282_p4), %s1943_s13, 1  ;;  %p340_p2 = scmp.lt.s32.totalorder (!%p282_p4), %s1534_s28, 1 }
  0x2a   : > { %p342_p5 = scmp.lt.s32.totalorder (!%p282_p4), %s1530_s27, 9  ;;  %s349_s17 = sadd.s32 (!%p282_p4), 1, %s1530_s27 }
  0x2b   : > { %s360_s19 = sadd.s32 (!%p282_p4), 2, %s1530_s27  ;;  %p352_p6 = scmp.lt.s32.totalorder (!%p282_p4), %s349_s17, 9 }
  0x2c   : > { %p363_p8 = scmp.lt.s32.totalorder (!%p282_p4), %s360_s19, 9  ;;  %s1733_s23 = scalar_lea.vmem (!%p282_p4), [#allocation2], %s1074_s14 }
  0x2d   : > { %s1735_s29 = scalar_lea.vmem (!%p282_p4), [#allocation4], %s1075_s16  ;;  %p1082_p9 = scmp.ne.s32.totalorder (!%p282_p4), %s1530_s27, 0 }
  0x2f   : > { %s341_s20 = scalar_select %p340_p2, %s1534_s28, 1 }
  0x30   : > { %s343_s11 = scalar_select %p342_p5, %s1530_s27, 9 }
  0x31   : > { %s1271_s30 = smul.u32 80, %s341_s20  ;;  %s2004_s17 = smov (!%p352_p6, %s349_s17), 9  ;;  %v1548_v0 = vmov (!%p1082_p9), 0.0  }
  0x32   : > { %s1076_s10 = sshll.u32 %s343_s11, 3  ;;  %s2006_s19 = smov (!%p363_p8, %s360_s19), 9  ;;  %376 = vst [vmem:[%s1735_s29] sm:$0x3] (!%p1082_p9), %v1548_v0 }
  0x33   : > { %s346_s26 = sadd.s32 %s1271_s30, %s1076_s10  ;;  %s1078_s13 = sshll.u32 %s2004_s17, 3 }
  0x34   : > { %s1077_s9 = sshll.u32 %s346_s26, 2  ;;  %s356_s12 = sadd.s32 %s1271_s30, %s1078_s13 }
  0x35   : > { %s1721_s21 = scalar_lea.vmem %s1928_s0, %s1077_s9  ;;  %s1080_s18 = sshll.u32 %s2006_s19, 3 }
  0x36   : > { %s1079_s24 = sshll.u32 %s356_s12, 2  ;;  %s367_s7 = sadd.s32 %s1271_s30, %s1080_s18 }
  0x37   : > { %s1726_s11 = scalar_lea.vmem %s1929_s1, %s1079_s24  ;;  %s1081_s10 = sshll.u32 %s367_s7, 2 }
  0x38   : > { %s1731_s22 = scalar_lea.vmem %s1930_s2, %s1081_s10  ;;  %375 = sbr.rel (%p1082_p9) target bundleno = 63 (0x3f), region = 44 }
  0x3f PF: > { %v1375_v1 = vld [vmem:[%s1931_s3] sm:$0xff]   ;;  %v1376_v2 = vld [vmem:[%s1931_s3 + $0x14] sm:$0xff]   ;;  %v1377_v3 = vld [vmem:[%s1931_s3 + $0x8] sm:$0xff]   ;;  %vm445_vm0 = vcmask 1041408   ;;  %vm432_vm1 = vcmask 293888   ;;  %s1138_s30 = sshll.u32 %s1534_s28, 6 }
  0x40   : > { %1195 = vmatprep.subr.bf16.mxu1 %v1375_v1  ;;  %1209 = vmatprep.subr.bf16.mxu0 %v1376_v2  ;;  %v1378_v4 = vld [vmem:[%s1931_s3 + $0x1c] sm:$0xff]   ;;  %v1379_v5 = vld [vmem:[%s1931_s3 + $0x10] ss:$0 sps:$4 sm:$0x33]   ;;  %v1383_v11 = vld [vmem:[%s1721_s21 + $0x8] sm:$0xff]   ;;  %s1975_s13 = sand.u32 1, %s1522_s25  }
  0x41   : > { %1196 = vmatpush3.bf16.msra.mxu1 %v1375_v1  ;;  %1210 = vmatpush3.bf16.msra.mxu0 %v1376_v2  ;;  %v1381_v6 = vld [vmem:[%s1721_s21] sm:$0xff]   ;;  %v447_v9 = vsel %vm445_vm0, %v1379_v5, 0  ;;  %v1384_v12 = vld [vmem:[%s1726_s11 + $0x8] sm:$0xff]   ;;  %v1386_v14 = vld [vmem:[%s1931_s3 + $0x30] sm:$0xff]   ;;  %s1822_s14 = scalar_lea.sflag [#allocation3], %s1975_s13  ;;  %s1549_s17 = smov [#allocation2]  }
  0x42   : > { %1197 = vmatprep.subr.bf16.mxu1 %v1377_v3  ;;  %1211 = vmatprep.subr.bf16.mxu0 %v1378_v4  ;;  %v1380_v7 = vld [vmem:[%s1931_s3 + $0x24] ss:$0 sps:$4 sm:$0x33]   ;;  %v1385_v13 = vld [vmem:[%s1931_s3 + $0x28] sm:$0xff]   ;;  %v1387_v15 = vld [vmem:[%s1721_s21 + $0x10] sm:$0xff]   ;;  %s1400_s19 = sshll.u32 %s1549_s17, 4  ;;  %s1401_s19 = int_to_ptr.vmem [resolvable:$false] %s1400_s19 }
  0x43   : > { %v1382_v8 = vld [vmem:[%s1726_s11] sm:$0xff]   ;;  %1201 = vmatprep.mubr.msk.bf16.mxu1 %vm432_vm1, %v1381_v6  ;;  %v584_v10 = vsel %vm445_vm0, %v1380_v7, 0  ;;  %v1388_v16 = vld [vmem:[%s1726_s11 + $0x10] sm:$0xff]   ;;  %v1391_v17 = vld [vmem:[%s1931_s3 + $0x38] ss:$0 sps:$4 sm:$0x33]  }
  0x44   : > { %1215 = vmatprep.mubr.msk.bf16.mxu0 %vm432_vm1, %v1382_v8  ;;  %v1389_v18 = vld [vmem:[%s1721_s21 + $0x18] sm:$0xff]   ;;  %v721_v20 = vsel %vm445_vm0, %v1391_v17, 0  ;;  %v1392_v21 = vld [vmem:[%s1731_s22] sm:$0xff]   ;;  %v1393_v22 = vld [vmem:[%s1731_s22 + $0x10] sm:$0xff]   ;;  %s1402_s10 = scalar_lea.vmem %s1401_s19, 1024 }
  0x45   : > { %1198 = vmatpush3.bf16.msra.mxu1 %v1377_v3  ;;  %1212 = vmatpush3.bf16.msra.mxu0 %v1378_v4  ;;  %v1390_v19 = vld [vmem:[%s1726_s11 + $0x18] sm:$0xff]   ;;  %v1394_v24 = vld [vmem:[%s1731_s22 + $0x8] sm:$0xff]   ;;  %v1083_v29 = vld [vmem:[%s1932_s4] ss:$0 sm:$0xff] }
  0x46   : > { %1267 = vmatprep.subr.msk.bf16.mxu1 %vm445_vm0, %v1379_v5  ;;  %1268 = vmatprep.subr.msk.bf16.mxu0 %vm445_vm0, %v1380_v7  ;;  %v1395_v23 = vld [vmem:[%s1731_s22 + $0x18] sm:$0xff]   ;;  %s1137_s22 = sshll.u32 %s1530_s27, 3  ;;  %s897_s27 = sshll.u32 %s1733_s23, 4  ;;  %s1809_s27 = int_to_ptr.vmem [resolvable:$true] %s897_s27 }
  0x47   : > { %s894_s7 = sadd.s32 %s1138_s30, %s1137_s22  ;;  %s1396_s16 = scalar_lea.vmem %s1809_s27, 512 }
  0x48   : > { %s1139_s18 = sshll.u32 %s894_s7, 6  ;;  %p1397_p10 = scmp.ne.s32.totalorder %s1809_s27, %s1396_s16 }
  0x49   : > { %1200 = vmatpush3.bf16.msra.mxu1 %v447_v9  ;;  %1214 = vmatpush3.bf16.msra.mxu0 %v584_v10  ;;  %s1815_s12 = scalar_lea.hbm %s1933_s5, %s1139_s18  ;;  %p1403_p1 = scmp.lt.s32.totalorder %s1809_s27, %s1401_s19 }
  0x4a   : > { %1237 = vmatprep.subr.bf16.mxu1 %v1385_v13  ;;  %1223 = vmatprep.subr.bf16.mxu0 %v1385_v13  ;;  %p1398_p11 = pnand %p1397_p10, %p1661_p3  ;;  %p1404_p4 = scmp.lt.s32.totalorder %s1402_s10, %s1396_s16 }
  0x4c   : > { %1202 = vmatmul.mubr.msk.bf16.vlgmr.msra.gmra.mrb[0].mxu1 %vm432_vm1, %v1383_v11  ;;  %1216 = vmatmul.mubr.msk.bf16.vlgmr.msra.gmra.mrb[0].mxu0 %vm432_vm1, %v1384_v12  ;;  %p1399_p0 = pneg %p1398_p11  ;;  %p1405_p2 = por %p1404_p4, %p1403_p1 }
  0x4d   : > { %1240 = vmatpush3.bf16.msra.mxu1 %v1385_v13  ;;  %1224 = vmatpush3.bf16.msra.mxu0 %v1385_v13 }
  0x4e   : > { %1205 = vmatprep.mubr.msk.bf16.mxu1 %vm432_vm1, %v1387_v15  ;;  %1225 = vmatprep.subr.bf16.mxu0 %v1386_v14  ;;  %p1406_p5 = pnand %p1405_p2, %p1399_p0 }
  0x4f   : > { %1219 = vmatprep.mubr.msk.bf16.mxu0 %vm432_vm1, %v1388_v16  ;;  %1238 = vmatprep.subr.bf16.mxu1 %v1386_v14 }
  0x51   : > { %1241 = vmatpush3.bf16.msra.mxu1 %v1386_v14  ;;  %1226 = vmatpush3.bf16.msra.mxu0 %v1386_v14 }
  0x52   : > { %1270 = vmatprep.subr.msk.bf16.mxu1 %vm445_vm0, %v1391_v17  ;;  %1269 = vmatprep.subr.msk.bf16.mxu0 %vm445_vm0, %v1391_v17 }
  0x54   : > { %1206 = vmatmul.mubr.msk.bf16.gmra.mrb[4].mxu1 %vm432_vm1, %v1389_v18  ;;  %1220 = vmatmul.mubr.msk.bf16.gmra.mrb[4].mxu0 %vm432_vm1, %v1390_v19 }
  0x55   : > { %1242 = vmatpush3.bf16.msra.mxu1 %v721_v20  ;;  %1228 = vmatpush3.bf16.msra.mxu0 %v721_v20 }
  0x56   : > { %1229 = vmatprep.mubr.msk.bf16.mxu0 %vm432_vm1, %v1392_v21  ;;  %1233 = vmatprep.mubr.msk.bf16.mxu1 %vm432_vm1, %v1393_v22 }
  0x5c   : > { %1234 = vmatmul.mubr.msk.bf16.vlgmr.msra.gmra.mrb[8].mxu1 %vm432_vm1, %v1395_v23  ;;  %1230 = vmatmul.mubr.msk.bf16.vlgmr.msra.gmra.mrb[0].mxu0 %vm432_vm1, %v1394_v24 }
 0x11f   : > { %v1203_v25 = vpop.f32.mrb[0].mxu1 }
 0x120   : > { %v483_v26 = vpop.f32.mrb[1].mxu1  ;;  %v516_v46 = vadd.f32 %v1203_v25, %v1083_v29 }
 0x121   : > { %v1204_v27 = vpop.f32.mrb[2].mxu1  ;;  %v514_v48 = vadd.f32 %v1083_v29, %v483_v26 }
 0x122   : > { %v486_v28 = vpop.f32.mrb[3].mxu1  ;;  %v517_v52 = vadd.f32 %v1204_v27, %v1083_v29 }
 0x123   : > { %v515_v57 = vadd.f32 %v1083_v29, %v486_v28 }
 0x127   : > { %v1207_v30 = vpop.f32.mrb[4].mxu1  ;;  %v1221_v32 = vpop.f32.mrb[4].mxu0 }
 0x128   : > { %v520_v31 = vadd.f32 %v1207_v30, %v1083_v29  ;;  %v499_v33 = vpop.f32.mrb[5].mxu1  ;;  %v636_v35 = vpop.f32.mrb[5].mxu0 }
 0x129   : > { %v518_v34 = vadd.f32 %v1083_v29, %v499_v33  ;;  %v1208_v36 = vpop.f32.mrb[6].mxu1  ;;  %v1222_v39 = vpop.f32.mrb[6].mxu0 }
 0x12a   : > { %v657_v37 = vadd.f32 %v1221_v32, %v520_v31  ;;  %v521_v38 = vadd.f32 %v1208_v36, %v1083_v29  ;;  %v502_v40 = vpop.f32.mrb[7].mxu1  ;;  %v639_v43 = vpop.f32.mrb[7].mxu0 }
 0x12b   : > { %v655_v41 = vadd.f32 %v636_v35, %v518_v34  ;;  %v519_v42 = vadd.f32 %v1083_v29, %v502_v40 }
 0x12c   : > { %v658_v44 = vadd.f32 %v1222_v39, %v521_v38 }
 0x12d   : > { %v656_v45 = vadd.f32 %v639_v43, %v519_v42 }
 0x12f   : > { %v1235_v47 = vpop.f32.mrb[8].mxu1  ;;  %v1231_v49 = vpop.f32.mrb[0].mxu0 }
 0x130   : > { %v1802_v50 = vadd.f32 %v1235_v47, %v657_v37  ;;  %v773_v51 = vpop.f32.mrb[9].mxu1  ;;  %v1244_v53 = vadd.f32 %v1231_v49, %v516_v46  ;;  %v757_v54 = vpop.f32.mrb[1].mxu0 }
 0x131   : > { %v792_v55 = vadd.f32 %v773_v51, %v655_v41  ;;  %v1236_v56 = vpop.f32.mrb[10].mxu1  ;;  %v1246_v58 = vadd.f32 %v757_v54, %v514_v48  ;;  %v1232_v59 = vpop.f32.mrb[2].mxu0 }
 0x132   : > { %v1804_v60 = vadd.f32 %v1236_v56, %v658_v44  ;;  %v776_v61 = vpop.f32.mrb[11].mxu1  ;;  %v1248_v62 = vadd.f32 %v1232_v59, %v517_v52  ;;  %v760_v63 = vpop.f32.mrb[3].mxu0  ;;  %v855_v9 = vmul.f32 %v1244_v53, %v1244_v53 }
 0x133   : > { %v793_v0 = vadd.f32 %v776_v61, %v656_v45  ;;  %v1250_v2 = vadd.f32 %v760_v63, %v515_v57  ;;  %v853_v5 = vmul.f32 %v1246_v58, %v1246_v58 }
 0x134   : > { %v1169_v1 = vpack.c.bf16 %v1804_v60, %v1802_v50  ;;  %v1159_v3 = vpack.c.bf16 %v1248_v62, %v1244_v53 }
 0x135   : > { %v1164_v4 = vpack.c.bf16 %v793_v0, %v792_v55  ;;  %v1154_v6 = vpack.c.bf16 %v1250_v2, %v1246_v58  ;;  %v837_v7 = vadd.f32 %v1250_v2, %v1246_v58  ;;  %v854_v8 = vmul.f32 %v1250_v2, %v1250_v2 }
 0x136   : > { %1173 = vst [vmem:[%s1733_s23 + $0x18] sm:$0xff] %v1169_v1   ;;  %1171 = vst [vmem:[%s1733_s23 + $0x8] sm:$0xff] %v1159_v3  }
 0x137   : > { %1172 = vst [vmem:[%s1733_s23 + $0x10] sm:$0xff] %v1164_v4   ;;  %1155 = vst [vmem:[%s1733_s23] sm:$0xff] %v1154_v6   ;;  %v838_v10 = vadd.f32 %v1244_v53, %v837_v7  ;;  %v861_v11 = vadd.f32 %v854_v8, %v853_v5 }
 0x138   : > { %1409 = shalt.err (!%p1406_p5)
}
 0x139   : > { %s1410_s23 = scalar_lea.hbm %s1815_s12, 512  ;;  %s1414_s6 = scalar_lea.hbm %s1933_s5, 8192 }
 0x13a   : > { %p1411_p6 = scmp.ne.s32.totalorder %s1815_s12, %s1410_s23  ;;  %p1415_p10 = scmp.lt.u32.totalorder %s1815_s12, %s1933_s5 }
 0x13b   : > { %p1416_p11 = scmp.lt.u32.totalorder %s1414_s6, %s1410_s23  ;;  %p1418_p1 = scmp.lt.u32.totalorder %s1410_s23, %s1815_s12 }
 0x13c   : > { %p1412_p8 = pnand %p1411_p6, %p1661_p3 }
 0x13d   : > { %p1417_p0 = por %p1416_p11, %p1415_p10 }
 0x13e   : > { %p1413_p9 = pneg %p1412_p8 }
 0x13f   : > { %p1419_p4 = por %p1418_p1, %p1417_p0 }
 0x141   : > { %p1420_p2 = pnand %p1419_p4, %p1413_p9 }
 0x143   : > { %1423 = shalt.err (!%p1420_p2)
}
 0x144   : > { %s1550_s11 = smov 64   ;;  %s1551_s22 = smov 4   ;;  %v856_v12 = vmul.f32 %v1248_v62, %v1248_v62  ;;  %v862_v13 = vadd.f32 %v861_v11, %v855_v9  ;;  %v839_v14 = vadd.f32 %v1248_v62, %v838_v10  ;;  %v857_v15 = vmul.f32 %v792_v55, %v792_v55  ;;  %v836_v37 = vld [vmem:[%s1735_s29] sm:$0x1]  ;;  %v852_v40 = vld [vmem:[%s1735_s29 + $0x1] sm:$0x1] }
 0x145   : > { %1272 = dma.vmem_to_hbm [thread:$0]  (%p1661_p3), %s1809_s27, 512, %s1815_s12, %s1822_s14, %s1550_s11, %s1550_s11, %s1551_s22   ;;  %v858_v19 = vmul.f32 %v793_v0, %v793_v0  ;;  %v859_v21 = vmul.f32 %v1802_v50, %v1802_v50  ;;  %v860_v24 = vmul.f32 %v1804_v60, %v1804_v60 }
 0x146   : > { %v840_v16 = vadd.f32 %v839_v14, %v792_v55  ;;  %v863_v17 = vadd.f32 %v862_v13, %v856_v12  ;;  %s1976_s15 = sld [smem:[#allocation9_spill]]  ;;  %s1140_s7 = sshll.u32 %s1534_s28, 5 }
 0x147   : > { %s913_s27 = sshll.u32 %s1735_s29, 4  ;;  %s1978_s9 = sld [smem:[#allocation23_spill]]  ;;  %s1862_s27 = int_to_ptr.vmem [resolvable:$true] %s913_s27 }
 0x148   : > { %v841_v18 = vadd.f32 %v840_v16, %v793_v0  ;;  %v864_v20 = vadd.f32 %v863_v17, %v857_v15  ;;  %s1424_s16 = scalar_lea.vmem %s1862_s27, 32  ;;  %s1552_s28 = smov [#allocation4]  }
 0x149   : > { %p1425_p3 = scmp.ne.s32.totalorder %s1862_s27, %s1424_s16  ;;  %s1428_s17 = sshll.u32 %s1552_s28, 4  ;;  %s1429_s17 = int_to_ptr.vmem [resolvable:$false] %s1428_s17 }
 0x14a   : > { %v842_v22 = vadd.f32 %v841_v18, %v1802_v50  ;;  %v865_v23 = vadd.f32 %v864_v20, %v858_v19  ;;  %s1430_s19 = scalar_lea.vmem %s1429_s17, 64  ;;  %p1431_p8 = scmp.lt.s32.totalorder %s1862_s27, %s1429_s17 }
 0x14b   : > { %p1426_p5 = pnand %p1425_p3, %p1688_p12  ;;  %p1432_p9 = scmp.lt.s32.totalorder %s1430_s19, %s1424_s16 }
 0x14c   : > { %v843_v25 = vadd.f32 %v842_v22, %v1804_v60  ;;  %v866_v26 = vadd.f32 %v865_v23, %v859_v21  ;;  %s1979_s13 = sand.u32 1, %s1976_s15  }
 0x14d   : > { %s1860_s12 = scalar_lea.hbm %s1978_s9, %s1140_s7  ;;  %s882_s14 = scalar_lea.sflag [#allocation5], %s1979_s13 }
 0x14e   : > { %v844_v27 = vrot.slane %v843_v25, 4  ;;  %v867_v28 = vadd.f32 %v866_v26, %v860_v24  ;;  %p1427_p6 = pneg %p1426_p5  ;;  %p1433_p10 = por %p1432_p9, %p1431_p8 }
 0x150   : > { %v845_v29 = vadd.f32 %v844_v27, %v843_v25  ;;  %v868_v30 = vrot.slane %v867_v28, 4  ;;  %p1434_p11 = pnand %p1433_p10, %p1427_p6 }
 0x152   : > { %v846_v31 = vrot.slane %v845_v29, 2  ;;  %v869_v32 = vadd.f32 %v868_v30, %v867_v28 }
 0x154   : > { %v847_v33 = vadd.f32 %v846_v31, %v845_v29  ;;  %v870_v34 = vrot.slane %v869_v32, 2 }
 0x156   : > { %v848_v35 = vrot.slane %v847_v33, 1  ;;  %v871_v36 = vadd.f32 %v870_v34, %v869_v32 }
 0x158   : > { %v849_v38 = vadd.f32 %v848_v35, %v847_v33  ;;  %v872_v39 = vrot.slane %v871_v36, 1 }
 0x15a   : > { %v850_v41 = vadd.f32 %v849_v38, %v836_v37  ;;  %v873_v42 = vadd.f32 %v872_v39, %v871_v36 }
 0x15c   : > { %851 = vst [vmem:[%s1735_s29] sm:$0x1] %v850_v41  ;;  %v874_v43 = vadd.f32 %v873_v42, %v852_v40 }
 0x15e   : > { %875 = vst [vmem:[%s1735_s29 + $0x1] sm:$0x1] %v874_v43 }
 0x15f   : > { %1437 = shalt.err (!%p1434_p11)
}
 0x160   : > { %s1438_s29 = scalar_lea.hbm %s1860_s12, 32  ;;  %s1442_s20 = scalar_lea.hbm %s1978_s9, 64 }
 0x161   : > { %p1439_p0 = scmp.ne.s32.totalorder %s1860_s12, %s1438_s29  ;;  %p1443_p2 = scmp.lt.u32.totalorder %s1860_s12, %s1978_s9 }
 0x162   : > { %p1444_p3 = scmp.lt.u32.totalorder %s1442_s20, %s1438_s29  ;;  %p1446_p6 = scmp.lt.u32.totalorder %s1438_s29, %s1860_s12 }
 0x163   : > { %p1440_p1 = pnand %p1439_p0, %p1688_p12 }
 0x164   : > { %p1445_p5 = por %p1444_p3, %p1443_p2 }
 0x165   : > { %p1441_p4 = pneg %p1440_p1 }
 0x166   : > { %p1447_p8 = por %p1446_p6, %p1445_p5 }
 0x168   : > { %p1448_p9 = pnand %p1447_p8, %p1441_p4 }
 0x16a   : > { %1451 = shalt.err (!%p1448_p9)
}
 0x16b   : > { %1273 = dma.vmem_to_hbm [thread:$0]  (%p1688_p12), %s1862_s27, 32, %s1860_s12, %s882_s14  }
 0x16c PF: > { %s1980_s24 = sld [smem:[#allocation15_spill]]  ;;  %s1981_s21 = sld [smem:[#allocation11_spill]] }
 0x172   : > { %p1283_p10 = scmp.ge.s32.totalorder %s1980_s24, 2  ;;  %s925_s22 = sand.u32 1, %s1981_s21  }
 0x173   : > { %s926_s15 = scalar_lea.sflag [#allocation3], %s925_s22 }
 0x174   : > { %p1277_p11 = pnand %p1283_p10, %p1676_p7 }
 0x176   : > { %1497 = dma.done.wait (!%p1277_p11), %s926_s15, 512  }
 0x177   : > { %1499 = vsyncadd (!%p1277_p11), %s926_s15, 4294966784  ;;  %s1983_s7 = sld [smem:[#allocation8_spill]]  ;;  %p1280_p0 = pnand %p1283_p10, %p1700_p13 }
 0x17d   : > { %s934_s8 = sand.u32 1, %s1983_s7  }
 0x17e   : > { %s935_s30 = scalar_lea.sflag [#allocation5], %s934_s8 }
 0x17f   : > { %1501 = dma.done.wait (!%p1280_p0), %s935_s30, 32  }
 0x180   : > { %1503 = vsyncadd (!%p1280_p0), %s935_s30, 4294967264  ;;  %s23_s7 = sadd.s32 1, %s1980_s24   ;;  %s1985_s21 = sld [smem:[#allocation9_spill]] }
 0x181   : > { %p20_p12 = scmp.ge.s32.totalorder %s23_s7, 18   ;;  %s1986_s22 = sld [smem:[#allocation10_spill]] }
 0x182   : > { %s1987_s23 = sld [smem:[#allocation20_spill]]  ;;  %s1988_s27 = sld [smem:[#allocation12_spill]] }
 0x183   : > { %s1989_s26 = sld [smem:[#allocation21_spill]]  ;;  %s1990_s12 = sld [smem:[#allocation13_spill]] }
 0x184   : > { %s1991_s28 = sld [smem:[#allocation14_spill]]  ;;  %s1992_s29 = sld [smem:[#allocation16_spill]] }
 0x185   : > { %s1993_s30 = sld [smem:[#allocation17_spill]]  ;;  %s1994_s24 = smov %s1522_s25 }
 0x186   :  { %22 = sbr.rel (!%p20_p12) target bundleno = 11 (0xb), region = 104 }
 0x188   : > { %s1995_s25 = smov %s1988_s27 }
 0x189   : > { %s1996_s27 = smov %s1990_s12 }
 0x18d   :  { %940 = vsyncpa [#allocation3], 1 }
 0x18e   :  { %942 = vsyncpa [#allocation3 + $0x1], 1 }
 0x18f   :  { %943 = vsyncpa [#allocation5], 1 }
 0x190   :  { %945 = vsyncpa [#allocation5 + $0x1], 1 }

</bundles_post_ra>
